<compile_context>
chip_gen: v5e
topology: v5e:2x2
jax: 0.10.0
libtpu: 0.0.40
codegen_flags: <defaults>
</compile_context>

<pallas_src>
import functools

import jax
import jax.numpy as jnp
from jax.experimental import pallas as pl
from jax.experimental.pallas import tpu as pltpu


def _round_up(a, b):
    return (a + b - 1) // b * b


def ffn_kernel(x_ref, w1_ref, b1_ref, w2_ref, b2_ref, gamma_ref, beta_ref,
               o_ref, acc_ref, *, d_in_real, eps):
    k = pl.program_id(1)

    @pl.when(k == 0)
    def _():
        acc_ref[...] = jnp.zeros_like(acc_ref)

    # Chunked FFN: h_k = relu(x @ W1[:, chunk] + b1[chunk]); acc += h_k @ W2[chunk, :]
    # bf16 MXU operands, f32 accumulation.
    h = jnp.dot(x_ref[...].astype(jnp.bfloat16), w1_ref[...],
                preferred_element_type=jnp.float32) + b1_ref[...]
    h = jnp.maximum(h, 0.0)                                   # (tm, tk) f32
    acc_ref[...] += jnp.dot(h.astype(jnp.bfloat16), w2_ref[...],
                            preferred_element_type=jnp.float32)

    @pl.when(k == pl.num_programs(1) - 1)
    def _():
        # dropout == identity (eval); residual add; LayerNorm in f32.
        z = acc_ref[...] + b2_ref[...] + x_ref[...].astype(jnp.float32)  # (tm, Dp)
        inv_d = jnp.float32(1.0 / d_in_real)
        # Pad lanes of z are exactly zero (x, b2 and padded W2 columns are zero), so
        # the sum over the padded axis equals the sum over the real d_in.
        mean = jnp.sum(z, axis=-1, keepdims=True) * inv_d
        zc = z - mean
        if z.shape[-1] != d_in_real:
            # zc is nonzero (-mean) in pad lanes -> mask them out of the variance.
            lane = jax.lax.broadcasted_iota(jnp.int32, z.shape, dimension=1)
            zc_var = jnp.where(lane < d_in_real, zc, 0.0)
        else:
            zc_var = zc
        var = jnp.sum(zc_var * zc_var, axis=-1, keepdims=True) * inv_d
        norm = zc * jax.lax.rsqrt(var + eps)
        o_ref[...] = (norm * gamma_ref[...] + beta_ref[...]).astype(o_ref.dtype)


def prepare_params(w1, b1, w2, b2, gamma, beta, *, tk=512):
    """Pad / cast parameters once (hoist this out of the per-call path when serving).

    w1: (d_in, d_hid); w2: (d_hid, d_in); b1: (1, d_hid); b2/gamma/beta: (1, d_in).
    (Conv1d(d_in, d_hid, 1).weight is (d_hid, d_in, 1); store it pre-transposed as
    (d_in, d_hid) so the kernel computes x @ W1 directly.)
    """
    d_in, d_hid = w1.shape
    Dp = _round_up(d_in, 128)                     # lane-dense channel dim
    tk_eff = min(tk, _round_up(d_hid, 128))       # hidden chunk (multiple of 128)
    Hp = _round_up(d_hid, tk_eff)                 # padded hidden dim, multiple of tk
    w1p = jnp.pad(w1, ((0, Dp - d_in), (0, Hp - d_hid))).astype(jnp.bfloat16)
    b1p = jnp.pad(b1, ((0, 0), (0, Hp - d_hid))).astype(jnp.float32)
    w2p = jnp.pad(w2, ((0, Hp - d_hid), (0, Dp - d_in))).astype(jnp.bfloat16)
    b2p = jnp.pad(b2, ((0, 0), (0, Dp - d_in))).astype(jnp.float32)
    gp = jnp.pad(gamma, ((0, 0), (0, Dp - d_in))).astype(jnp.float32)
    bp = jnp.pad(beta, ((0, 0), (0, Dp - d_in))).astype(jnp.float32)
    return dict(w1=w1p, b1=b1p, w2=w2p, b2=b2p, gamma=gp, beta=bp,
                d_in=d_in, d_hid=d_hid, Dp=Dp, Hp=Hp, tk=tk_eff)


def positionwise_ffn(x, params, *, tm=256, eps=1e-5):
    """x: (B, L, d_in); params: output of prepare_params().

    tm=256 is a good default on v5e/v7x; on v6e (128 MiB VMEM) tm=512 is worth trying.
    """
    B, L, d_in = x.shape
    assert d_in == params["d_in"]
    Dp, Hp, tk = params["Dp"], params["Hp"], params["tk"]
    M = B * L

    # Row tile: multiple of 8, clamped for tiny inputs.
    tm_eff = min(tm, max(8, _round_up(M, 8)))
    Mp = _round_up(M, tm_eff)

    x2 = x.reshape(M, d_in)
    if Mp != M or Dp != d_in:
        # Only materialize a padded copy when padding is actually required.
        x2 = jnp.pad(x2, ((0, Mp - M), (0, Dp - d_in)))

    nk = Hp // tk
    grid = (Mp // tm_eff, nk)

    # Size the scoped-VMEM request from the actual chunked footprint + headroom,
    # capped at 48 MiB so it never asks for v7x's entire 64 MiB.
    ebytes = jnp.dtype(x.dtype).itemsize
    vmem_need = (2 * tm_eff * Dp * ebytes          # x row tile, double-buffered
                 + 2 * tm_eff * Dp * ebytes        # out row tile, double-buffered
                 + tm_eff * Dp * 4                 # f32 accumulator scratch
                 + 2 * (Dp * tk + tk * Dp) * 2     # bf16 W1/W2 chunks, double-buffered
                 + 2 * (tk + 3 * Dp) * 4)          # b1 chunk + b2/gamma/beta
    vmem_limit = int(min(max(2 * vmem_need + (8 << 20), 32 << 20), 48 << 20))

    cost = pl.CostEstimate(
        flops=4 * Mp * Dp * Hp,                    # two matmuls: 2*M*D*H each
        transcendentals=Mp,                        # one rsqrt per row
        bytes_accessed=(2 * Mp * Dp * ebytes       # x in + out
                        + 2 * Dp * Hp * 2          # W1 + W2 (bf16)
                        + (Hp + 3 * Dp) * 4),
    )

    const = lambda i, k: (0, 0)
    out = pl.pallas_call(
        functools.partial(ffn_kernel, d_in_real=d_in, eps=eps),
        out_shape=jax.ShapeDtypeStruct((Mp, Dp), x.dtype),
        grid_spec=pltpu.PrefetchScalarGridSpec(
            num_scalar_prefetch=0,
            grid=grid,
            in_specs=[
                pl.BlockSpec((tm_eff, Dp), lambda i, k: (i, 0)),   # x rows (resident across k)
                pl.BlockSpec((Dp, tk), lambda i, k: (0, k)),        # W1 chunk
                pl.BlockSpec((1, tk), lambda i, k: (0, k)),         # b1 chunk
                pl.BlockSpec((tk, Dp), lambda i, k: (k, 0)),         # W2 chunk
                pl.BlockSpec((1, Dp), const, pipeline_mode=pl.Buffered(1)),   # b2
                pl.BlockSpec((1, Dp), const, pipeline_mode=pl.Buffered(1)),   # gamma
                pl.BlockSpec((1, Dp), const, pipeline_mode=pl.Buffered(1)),   # beta
            ],
            out_specs=pl.BlockSpec((tm_eff, Dp), lambda i, k: (i, 0)),
            scratch_shapes=[pltpu.VMEM((tm_eff, Dp), jnp.float32)],
        ),
        compiler_params=pltpu.CompilerParams(
            dimension_semantics=("parallel", "arbitrary"),   # rows megacore-sharded; hid serial
            vmem_limit_bytes=vmem_limit,
        ),
        cost_estimate=cost,
    )(x2, params["w1"], params["b1"], params["w2"], params["b2"],
      params["gamma"], params["beta"])

    if Mp != M or Dp != d_in:
        out = out[:M, :d_in]
    return out.reshape(B, L, d_in)


def reference(x, w1, b1, w2, b2, gamma, beta):
    h = jnp.maximum(jnp.einsum("bld,dh->blh", x, w1) + b1[0], 0.0)
    y = jnp.einsum("blh,hd->bld", h, w2) + b2[0]
    z = y + x
    mean = jnp.mean(z, axis=-1, keepdims=True)
    var = jnp.mean((z - mean) ** 2, axis=-1, keepdims=True)
    return (z - mean) * jax.lax.rsqrt(var + 1e-5) * gamma[0] + beta[0]


def _run_case(key, B, L, d_in, d_hid, tk=512):
    k_x, k_w1, k_b1, k_w2, k_b2 = jax.random.split(key, 5)
    x = jax.random.normal(k_x, (B, L, d_in), dtype=jnp.float32)
    w1 = jax.random.normal(k_w1, (d_in, d_hid), dtype=jnp.float32) / jnp.sqrt(d_in)
    b1 = jax.random.normal(k_b1, (1, d_hid), dtype=jnp.float32) * 0.02
    w2 = jax.random.normal(k_w2, (d_hid, d_in), dtype=jnp.float32) / jnp.sqrt(d_hid)
    b2 = jax.random.normal(k_b2, (1, d_in), dtype=jnp.float32) * 0.02
    gamma = jnp.ones((1, d_in), dtype=jnp.float32)
    beta = jnp.zeros((1, d_in), dtype=jnp.float32)

    params = prepare_params(w1, b1, w2, b2, gamma, beta, tk=tk)   # hoisted weight prep
    out = jax.block_until_ready(positionwise_ffn(x, params))
    ref = reference(x, w1, b1, w2, b2, gamma, beta)
    assert out.shape == (B, L, d_in)
    # bf16 matmul operands (f32 accumulation) -> loosened tolerance vs pure-f32 reference.
    assert jnp.allclose(out, ref, atol=5e-2, rtol=5e-2), "mismatch vs reference"


if __name__ == "__main__":
    key = jax.random.PRNGKey(0)
    k1, k2, k3 = jax.random.split(key, 3)

    # Small toy shape (lane padding on both channel dims, single hidden chunk).
    _run_case(k1, B=2, L=8, d_in=32, d_hid=64)
    # Lane-dense shape, multiple hidden chunks (exercises the accumulation axis).
    _run_case(k2, B=2, L=64, d_in=128, d_hid=512, tk=128)
    # Row padding + lane padding + multi-chunk accumulation.
    _run_case(k3, B=2, L=200, d_in=96, d_hid=384, tk=128)

    print("KERNEL_OK")
</pallas_src>

<mosaic_0001>
module attributes {stable_mosaic.version = 11 : i64} {
  func.func @ffn_kernel(%arg0: i32, %arg1: i32, %arg2: memref<16x128xf32, #tpu.memory_space<vmem>>, %arg3: memref<128x128xbf16, #tpu.memory_space<vmem>>, %arg4: memref<1x128xf32, #tpu.memory_space<vmem>>, %arg5: memref<128x128xbf16, #tpu.memory_space<vmem>>, %arg6: memref<1x128xf32, #tpu.memory_space<vmem>>, %arg7: memref<1x128xf32, #tpu.memory_space<vmem>>, %arg8: memref<1x128xf32, #tpu.memory_space<vmem>>, %arg9: memref<16x128xf32, #tpu.memory_space<vmem>>, %arg10: memref<16x128xf32, #tpu.memory_space<vmem>>) attributes {dimension_semantics = [#tpu.dimension_semantics<parallel>, #tpu.dimension_semantics<arbitrary>], iteration_bounds = array<i64: 1, 1>, scalar_prefetch = 0 : i64, scratch_operands = 1 : i64, tpu.core_type = #tpu.core_type<tc>, window_params = [{transform_indices = @transform_0, window_bounds = array<i64: 16, 128>}, {transform_indices = @transform_1, window_bounds = array<i64: 128, 128>}, {transform_indices = @transform_2, window_bounds = array<i64: 1, 128>}, {transform_indices = @transform_3, window_bounds = array<i64: 128, 128>}, {pipeline_mode = #tpu.pipeline_mode<synchronous>, transform_indices = @transform_4, window_bounds = array<i64: 1, 128>}, {pipeline_mode = #tpu.pipeline_mode<synchronous>, transform_indices = @transform_5, window_bounds = array<i64: 1, 128>}, {pipeline_mode = #tpu.pipeline_mode<synchronous>, transform_indices = @transform_6, window_bounds = array<i64: 1, 128>}, {transform_indices = @transform_7, window_bounds = array<i64: 16, 128>}]} {
    %c0_i32 = arith.constant 0 : i32
    %0 = arith.cmpi eq, %arg1, %c0_i32 : i32
    %1 = arith.extui %0 : i1 to i32
    %c0_i32_0 = arith.constant 0 : i32
    %2 = arith.cmpi ne, %1, %c0_i32_0 : i32
    scf.if %2 {
      %cst_16 = arith.constant 0.000000e+00 : f32
      %21 = vector.broadcast %cst_16 : f32 to vector<16x128xf32>
      %c0_17 = arith.constant 0 : index
      %c0_18 = arith.constant 0 : index
      %22 = vector.load %arg10[%c0_17, %c0_18] : memref<16x128xf32, #tpu.memory_space<vmem>>, vector<16x128xf32>
      tpu.vector_store %arg10[%c0_17, %c0_18], %21 {strides = array<i32>} : memref<16x128xf32, #tpu.memory_space<vmem>>, vector<16x128xf32>,
    } else {
    }
    %c0 = arith.constant 0 : index
    %c0_1 = arith.constant 0 : index
    %3 = vector.load %arg2[%c0, %c0_1] : memref<16x128xf32, #tpu.memory_space<vmem>>, vector<16x128xf32>
    %4 = arith.truncf %3 : vector<16x128xf32> to vector<16x128xbf16>
    %c0_2 = arith.constant 0 : index
    %c0_3 = arith.constant 0 : index
    %5 = vector.load %arg3[%c0_2, %c0_3] : memref<128x128xbf16, #tpu.memory_space<vmem>>, vector<128x128xbf16>
    %cst = arith.constant dense<0.000000e+00> : vector<16x128xf32>
    %6 = tpu.matmul %4, %5, %cst {dimension_numbers = #tpu.dot_dimension_numbers<[1], [0], [0], [1], [0, 0, 1, 1], [], []>} : vector<16x128xbf16>, vector<128x128xbf16>, vector<16x128xf32> -> vector<16x128xf32>
    %c0_4 = arith.constant 0 : index
    %c0_5 = arith.constant 0 : index
    %7 = vector.load %arg4[%c0_4, %c0_5] : memref<1x128xf32, #tpu.memory_space<vmem>>, vector<1x128xf32>
    %8 = vector.broadcast %7 : vector<1x128xf32> to vector<16x128xf32>
    %9 = arith.addf %6, %8 : vector<16x128xf32>
    %cst_6 = arith.constant 0.000000e+00 : f32
    %10 = vector.broadcast %cst_6 : f32 to vector<16x128xf32>
    %11 = arith.maximumf %9, %10 : vector<16x128xf32>
    %c0_7 = arith.constant 0 : index
    %c0_8 = arith.constant 0 : index
    %12 = vector.load %arg10[%c0_7, %c0_8] : memref<16x128xf32, #tpu.memory_space<vmem>>, vector<16x128xf32>
    %13 = arith.truncf %11 : vector<16x128xf32> to vector<16x128xbf16>
    %c0_9 = arith.constant 0 : index
    %c0_10 = arith.constant 0 : index
    %14 = vector.load %arg5[%c0_9, %c0_10] : memref<128x128xbf16, #tpu.memory_space<vmem>>, vector<128x128xbf16>
    %cst_11 = arith.constant dense<0.000000e+00> : vector<16x128xf32>
    %15 = tpu.matmul %13, %14, %cst_11 {dimension_numbers = #tpu.dot_dimension_numbers<[1], [0], [0], [1], [0, 0, 1, 1], [], []>} : vector<16x128xbf16>, vector<128x128xbf16>, vector<16x128xf32> -> vector<16x128xf32>
    %16 = arith.addf %12, %15 : vector<16x128xf32>
    %c0_12 = arith.constant 0 : index
    %c0_13 = arith.constant 0 : index
    %17 = vector.load %arg10[%c0_12, %c0_13] : memref<16x128xf32, #tpu.memory_space<vmem>>, vector<16x128xf32>
    tpu.vector_store %arg10[%c0_12, %c0_13], %16 {strides = array<i32>} : memref<16x128xf32, #tpu.memory_space<vmem>>, vector<16x128xf32>,
    %c0_i32_14 = arith.constant 0 : i32
    %18 = arith.cmpi eq, %arg1, %c0_i32_14 : i32
    %19 = arith.extui %18 : i1 to i32
    %c0_i32_15 = arith.constant 0 : i32
    %20 = arith.cmpi ne, %19, %c0_i32_15 : i32
    scf.if %20 {
      %c0_16 = arith.constant 0 : index
      %c0_17 = arith.constant 0 : index
      %21 = vector.load %arg10[%c0_16, %c0_17] : memref<16x128xf32, #tpu.memory_space<vmem>>, vector<16x128xf32>
      %c0_18 = arith.constant 0 : index
      %c0_19 = arith.constant 0 : index
      %22 = vector.load %arg6[%c0_18, %c0_19] : memref<1x128xf32, #tpu.memory_space<vmem>>, vector<1x128xf32>
      %23 = vector.broadcast %22 : vector<1x128xf32> to vector<16x128xf32>
      %24 = arith.addf %21, %23 : vector<16x128xf32>
      %c0_20 = arith.constant 0 : index
      %c0_21 = arith.constant 0 : index
      %25 = vector.load %arg2[%c0_20, %c0_21] : memref<16x128xf32, #tpu.memory_space<vmem>>, vector<16x128xf32>
      %26 = arith.addf %24, %25 : vector<16x128xf32>
      %cst_22 = arith.constant dense<0.000000e+00> : vector<16xf32>
      %27 = vector.multi_reduction <add>, %26, %cst_22 [1] : vector<16x128xf32> to vector<16xf32>
      %28 = vector.shape_cast %27 : vector<16xf32> to vector<16x1xf32>
      %cst_23 = arith.constant 3.125000e-02 : f32
      %29 = vector.broadcast %cst_23 : f32 to vector<16x1xf32>
      %30 = arith.mulf %28, %29 : vector<16x1xf32>
      %31 = vector.broadcast %30 : vector<16x1xf32> to vector<16x128xf32>
      %32 = arith.subf %26, %31 : vector<16x128xf32>
      %33 = tpu.iota {dimensions = array<i32: 1>} : vector<16x128xi32>
      %c32_i32 = arith.constant 32 : i32
      %34 = vector.broadcast %c32_i32 : i32 to vector<16x128xi32>
      %35 = arith.cmpi slt, %33, %34 : vector<16x128xi32>
      %cst_24 = arith.constant 0.000000e+00 : f32
      %36 = vector.broadcast %cst_24 : f32 to vector<16x128xf32>
      %37 = arith.select %35, %32, %36 : vector<16x128xi1>, vector<16x128xf32>
      %38 = arith.mulf %37, %37 : vector<16x128xf32>
      %cst_25 = arith.constant dense<0.000000e+00> : vector<16xf32>
      %39 = vector.multi_reduction <add>, %38, %cst_25 [1] : vector<16x128xf32> to vector<16xf32>
      %40 = vector.shape_cast %39 : vector<16xf32> to vector<16x1xf32>
      %cst_26 = arith.constant 3.125000e-02 : f32
      %41 = vector.broadcast %cst_26 : f32 to vector<16x1xf32>
      %42 = arith.mulf %40, %41 : vector<16x1xf32>
      %cst_27 = arith.constant 9.99999974E-6 : f32
      %43 = vector.broadcast %cst_27 : f32 to vector<16x1xf32>
      %44 = arith.addf %42, %43 : vector<16x1xf32>
      %45 = math.rsqrt %44 : vector<16x1xf32>
      %46 = vector.broadcast %45 : vector<16x1xf32> to vector<16x128xf32>
      %47 = arith.mulf %32, %46 : vector<16x128xf32>
      %c0_28 = arith.constant 0 : index
      %c0_29 = arith.constant 0 : index
      %48 = vector.load %arg7[%c0_28, %c0_29] : memref<1x128xf32, #tpu.memory_space<vmem>>, vector<1x128xf32>
      %49 = vector.broadcast %48 : vector<1x128xf32> to vector<16x128xf32>
      %50 = arith.mulf %47, %49 : vector<16x128xf32>
      %c0_30 = arith.constant 0 : index
      %c0_31 = arith.constant 0 : index
      %51 = vector.load %arg8[%c0_30, %c0_31] : memref<1x128xf32, #tpu.memory_space<vmem>>, vector<1x128xf32>
      %52 = vector.broadcast %51 : vector<1x128xf32> to vector<16x128xf32>
      %53 = arith.addf %50, %52 : vector<16x128xf32>
      %c0_32 = arith.constant 0 : index
      %c0_33 = arith.constant 0 : index
      %54 = vector.load %arg9[%c0_32, %c0_33] : memref<16x128xf32, #tpu.memory_space<vmem>>, vector<16x128xf32>
      tpu.vector_store %arg9[%c0_32, %c0_33], %53 {strides = array<i32>} : memref<16x128xf32, #tpu.memory_space<vmem>>, vector<16x128xf32>,
    } else {
    }
    return
  }
  func.func @transform_0(%arg0: i32, %arg1: i32) -> (i32, i32) {
    %c0_i32 = arith.constant 0 : i32
    %c0_i32_0 = arith.constant 0 : i32
    return %arg0, %c0_i32 : i32, i32
  }
  func.func @transform_1(%arg0: i32, %arg1: i32) -> (i32, i32) {
    %c0_i32 = arith.constant 0 : i32
    %c0_i32_0 = arith.constant 0 : i32
    return %c0_i32, %arg1 : i32, i32
  }
  func.func @transform_2(%arg0: i32, %arg1: i32) -> (i32, i32) {
    %c0_i32 = arith.constant 0 : i32
    %c0_i32_0 = arith.constant 0 : i32
    return %c0_i32, %arg1 : i32, i32
  }
  func.func @transform_3(%arg0: i32, %arg1: i32) -> (i32, i32) {
    %c0_i32 = arith.constant 0 : i32
    %c0_i32_0 = arith.constant 0 : i32
    return %arg1, %c0_i32 : i32, i32
  }
  func.func @transform_4(%arg0: i32, %arg1: i32) -> (i32, i32) {
    %c0_i32 = arith.constant 0 : i32
    %c0_i32_0 = arith.constant 0 : i32
    %c0_i32_1 = arith.constant 0 : i32
    return %c0_i32, %c0_i32_0 : i32, i32
  }
  func.func @transform_5(%arg0: i32, %arg1: i32) -> (i32, i32) {
    %c0_i32 = arith.constant 0 : i32
    %c0_i32_0 = arith.constant 0 : i32
    %c0_i32_1 = arith.constant 0 : i32
    return %c0_i32, %c0_i32_0 : i32, i32
  }
  func.func @transform_6(%arg0: i32, %arg1: i32) -> (i32, i32) {
    %c0_i32 = arith.constant 0 : i32
    %c0_i32_0 = arith.constant 0 : i32
    %c0_i32_1 = arith.constant 0 : i32
    return %c0_i32, %c0_i32_0 : i32, i32
  }
  func.func @transform_7(%arg0: i32, %arg1: i32) -> (i32, i32) {
    %c0_i32 = arith.constant 0 : i32
    %c0_i32_0 = arith.constant 0 : i32
    return %arg0, %c0_i32 : i32, i32
  }
}

</mosaic_0001>

<bundles_post_ra>
// kernel: tpu_custom_call.1
= control target key start
LH: loop header
LB: loop body
LE: loop exit
PB: predicated region body
PF: predicated region fallthrough
CT: control target
= control target key end

     0   :  { %12 = vsyncpa [#allocation4], 0  ;;  %s622_s0 = inlined_call_operand.hbm [shape: f32[16,128], index: 0, kind: input, shape index: {}]   ;;  %s623_s1 = inlined_call_operand.hbm [shape: bf16[128,128], index: 1, kind: input, shape index: {}]   ;;  %s624_s2 = inlined_call_operand.vmem [shape: f32[1,128], index: 2, kind: input, shape index: {}]   ;;  %s625_s3 = inlined_call_operand.hbm [shape: bf16[128,128], index: 3, kind: input, shape index: {}]   ;;  %s626_s4 = inlined_call_operand.vmem [shape: f32[1,128], index: 4, kind: input, shape index: {}]   ;;  %s627_s5 = inlined_call_operand.vmem [shape: f32[1,128], index: 5, kind: input, shape index: {}]   ;;  %s628_s6 = inlined_call_operand.vmem [shape: f32[1,128], index: 6, kind: input, shape index: {}]   ;;  %s629_s7 = inlined_call_operand.hbm [shape: f32[16,128], index: 7, kind: output, shape index: {}]  }
   0x1   :  { %13 = vsyncpa [#allocation7], 0  ;;  %s32_s26 = sshll.u32 %s623_s1, 4  ;;  %s33_s26 = int_to_ptr.hbm [resolvable:$true] %s32_s26 }
   0x2   :  { %14 = vsyncpa [#allocation5], 0  ;;  %s544_s27 = smov [#allocation6]   ;;  %s19_s8 = sshll.u32 %s622_s0, 4  ;;  %s20_s8 = int_to_ptr.hbm [resolvable:$true] %s19_s8 }
   0x3   :  { %s34_s28 = sshll.u32 %s544_s27, 4  ;;  %s545_s9 = smov 64   ;;  %s35_s28 = int_to_ptr.vmem [resolvable:$true] %s34_s28 }
   0x4   :  { %s546_s10 = smov 4   ;;  %s547_s11 = smov [#allocation3]  }
   0x5   :  { %40 = dma.hbm_to_vmem [thread:$0]  %s33_s26, 1024, %s35_s28, [#allocation7], %s545_s9, %s545_s9, %s546_s10  }
   0x6   :  { %s21_s12 = sshll.u32 %s547_s11, 4  ;;  %s548_s13 = smov 128   ;;  %s22_s12 = int_to_ptr.vmem [resolvable:$true] %s21_s12 }
   0x7   :  { %s549_s14 = smov 8   ;;  %s47_s16 = sshll.u32 %s625_s3, 4  ;;  %s48_s16 = int_to_ptr.hbm [resolvable:$true] %s47_s16 }
   0x8   :  { %27 = dma.hbm_to_vmem [thread:$0]  %s20_s8, 256, %s22_s12, [#allocation4], %s548_s13, %s548_s13, %s549_s14  }
   0x9   :  { %s550_s17 = smov [#allocation8]  }
   0xa   :  { %s49_s0 = sshll.u32 %s550_s17, 4  ;;  %s50_s0 = int_to_ptr.vmem [resolvable:$true] %s49_s0 }
   0xb   :  { %55 = dma.hbm_to_vmem [thread:$0]  %s48_s16, 1024, %s50_s0, [#allocation7], %s545_s9, %s545_s9, %s546_s10  }
   0xc   :  { %538 = dma.done.wait [#allocation4], 256  }
   0xd   :  { %539 = vsyncadd [#allocation4], 4294967040 }
   0xe   :  { %540 = dma.done.wait [#allocation7], 2048  }
   0xf   :  { %541 = vsyncadd [#allocation7], 4294965248  ;;  %v417_v0 = vld [vmem:[#allocation6 + $0x38] sm:$0xff]  ;;  %v416_v1 = vld [vmem:[#allocation6 + $0x30] sm:$0xff]  ;;  %v275_v34 = vlaneseq  ;;  %s551_s23 = smov [#allocation9]   ;;  %s332_s26 = sshll.u32 %s629_s7, 4  ;;  %s333_s26 = int_to_ptr.hbm [resolvable:$true] %s332_s26 }
  0x10   :  { %151 = vmatpush.bf16.msra.mxu0 %v417_v0  ;;  %v425_v2 = vld [vmem:[#allocation8 + $0x38] sm:$0xff]  ;;  %v424_v3 = vld [vmem:[#allocation8 + $0x30] sm:$0xff]  ;;  %v415_v4 = vld [vmem:[#allocation6 + $0x28] sm:$0xff] }
  0x11   :  { %234 = vmatpush.bf16.msra.mxu1 %v425_v2  ;;  %v423_v5 = vld [vmem:[#allocation8 + $0x28] sm:$0xff]  ;;  %v414_v6 = vld [vmem:[#allocation6 + $0x20] sm:$0xff]  ;;  %v413_v8 = vld [vmem:[#allocation6 + $0x18] sm:$0xff]  ;;  %v276_v35 = vand.u32 127, %v275_v34 }
  0x12   :  { %v422_v7 = vld [vmem:[#allocation8 + $0x20] sm:$0xff]  ;;  %v412_v9 = vld [vmem:[#allocation6 + $0x10] sm:$0xff]  ;;  %v411_v10 = vld [vmem:[#allocation6 + $0x8] sm:$0xff] }
  0x13   :  { %v410_v11 = vld [vmem:[#allocation6] sm:$0xff]  ;;  %v80_v12 = vld [vmem:[#allocation3] sm:$0xff]  ;;  %v81_v13 = vld [vmem:[#allocation3 + $0x8] sm:$0xff]  ;;  %vm277_vm0 = vcmp.lt.s32.totalorder %v276_v35, 32 }
  0x14   :  { %152 = vmatpush.bf16.msra.mxu0 %v416_v1  ;;  %v82_v14 = vpack.c.bf16 %v81_v13, %v80_v12  ;;  %v421_v15 = vld [vmem:[#allocation8 + $0x18] sm:$0xff]  ;;  %v420_v16 = vld [vmem:[#allocation8 + $0x10] sm:$0xff]  ;;  %v419_v17 = vld [vmem:[#allocation8 + $0x8] sm:$0xff] }
  0x15   :  { %235 = vmatpush.bf16.msra.mxu1 %v424_v3  ;;  %v418_v18 = vld [vmem:[#allocation8] sm:$0xff]  ;;  %v434_v20 = vld [vmem:[%s624_s2] ss:$0 sm:$0xff] }
  0x16   :  { %v435_v27 = vld [vmem:[%s626_s4] ss:$0 sm:$0xff] }
  0x17   :  { %v436_v60 = vld [vmem:[%s627_s5] ss:$0 sm:$0xff]  ;;  %s330_s5 = sshll.u32 %s551_s23, 4  ;;  %s331_s5 = int_to_ptr.vmem [resolvable:$true] %s330_s5 }
  0x18   :  { %153 = vmatpush.bf16.msra.mxu0 %v415_v4  ;;  %v437_v0 = vld [vmem:[%s628_s6] ss:$0 sm:$0xff] }
  0x19   :  { %236 = vmatpush.bf16.msra.mxu1 %v423_v5 }
  0x1c   :  { %154 = vmatpush.bf16.msra.mxu0 %v414_v6 }
  0x1d   :  { %237 = vmatpush.bf16.msra.mxu1 %v422_v7 }
  0x20   :  { %155 = vmatpush.bf16.msra.mxu0 %v413_v8 }
  0x21   :  { %238 = vmatpush.bf16.msra.mxu1 %v421_v15 }
  0x24   :  { %156 = vmatpush.bf16.msra.mxu0 %v412_v9 }
  0x25   :  { %239 = vmatpush.bf16.msra.mxu1 %v420_v16 }
  0x28   :  { %157 = vmatpush.bf16.msra.mxu0 %v411_v10 }
  0x29   :  { %240 = vmatpush.bf16.msra.mxu1 %v419_v17 }
  0x2c   :  { %158 = vmatpush.bf16.msra.mxu0 %v410_v11 }
  0x2d   :  { %241 = vmatpush.bf16.msra.mxu1 %v418_v18 }
  0x2f   :  { %159 = vmatmul.bf16.vlgmr.msra.gmra.mxu0 %v82_v14 }
  0xac   :  { %v160_v19 = vpop.f32.mrf.mxu0 }
  0xad   :  { %v161_v21 = vadd.f32 %v434_v20, %v160_v19 }
  0xaf   :  { %v165_v24 = vmax.f32 %v161_v21, 0.0 }
  0xb4   :  { %v162_v22 = vpop.f32.mrf.mxu0 }
  0xb5   :  { %v163_v23 = vadd.f32 %v434_v20, %v162_v22 }
  0xb7   :  { %v166_v25 = vmax.f32 %v163_v23, 0.0 }
  0xb9   :  { %v169_v26 = vpack.c.bf16 %v166_v25, %v165_v24 }
  0xbb   :  { %242 = vmatmul.bf16.vlgmr.msra.gmra.mxu1 %v169_v26 }
 0x138   :  { %v243_v28 = vpop.f32.mrf.mxu1 }
 0x139   :  { %v261_v29 = vadd.f32 %v435_v27, %v243_v28 }
 0x13b   :  { %v265_v30 = vadd.f32 %v261_v29, %v80_v12 }
 0x13d   :  { %267 = vadd.xlane.f32.xlu0 %v265_v30 }
 0x140   :  { %v245_v31 = vpop.f32.mrf.mxu1 }
 0x141   :  { %v262_v32 = vadd.f32 %v435_v27, %v245_v31 }
 0x143   :  { %v266_v33 = vadd.f32 %v262_v32, %v81_v13 }
 0x145   :  { %269 = vadd.xlane.f32.xlu0 %v266_v33 }
 0x1b0   :  { %v268_v36 = vpop.xlane.xlu0 %267 }
 0x1b1   :  { %v271_v37 = vmul.f32 0.03125, %v268_v36 }
 0x1b3   :  { %v273_v38 = vsub.f32 %v265_v30, %v271_v37 }
 0x1b5   :  { %v278_v39 = vsel %vm277_vm0, %v273_v38, 0.0 }
 0x1b6   :  { %v280_v40 = vmul.f32 %v278_v39, %v278_v39 }
 0x1b8   :  { %282 = vadd.xlane.f32.xlu1 %v280_v40  ;;  %v270_v41 = vpop.xlane.xlu0 %269 }
 0x1b9   :  { %v272_v42 = vmul.f32 0.03125, %v270_v41 }
 0x1bb   :  { %v274_v43 = vsub.f32 %v266_v33, %v272_v42 }
 0x1bd   :  { %v279_v44 = vsel %vm277_vm0, %v274_v43, 0.0 }
 0x1be   :  { %v281_v45 = vmul.f32 %v279_v44, %v279_v44 }
 0x1c0   :  { %284 = vadd.xlane.f32.xlu1 %v281_v45 }
 0x22b   :  { %v283_v46 = vpop.xlane.xlu1 %282 }
 0x22c   :  { %v286_v47 = vmul.f32 0.03125, %v283_v46 }
 0x22e   :  { %v288_v48 = vadd.f32 1e-05, %v286_v47 }
 0x230   :  { %438 = vrsqrt.f32 %v288_v48  ;;  %vm296_vm2 = vweird.f32 %v288_v48 }
 0x233   :  { %v285_v49 = vpop.xlane.xlu1 %284 }
 0x234   :  { %v287_v50 = vmul.f32 0.03125, %v285_v49 }
 0x236   :  { %v439_v51 = vpop.eup %438  ;;  %v289_v52 = vadd.f32 1e-05, %v287_v50 }
 0x237   :  { %v291_v53 = vmul.f32 %v439_v51, %v288_v48  ;;  %vm297_vm1 = vweird.f32 %v439_v51 }
 0x238   :  { %440 = vrsqrt.f32 %v289_v52  ;;  %vm298_vm3 = vmor %vm296_vm2, %vm297_vm1  ;;  %vm306_vm5 = vweird.f32 %v289_v52 }
 0x239   :  { %v292_v54 = vmul.f32 %v439_v51, %v291_v53 }
 0x23b   :  { %v293_v55 = vmul.f32 0.5, %v292_v54 }
 0x23d   :  { %v294_v56 = vsub.f32 1.5, %v293_v55 }
 0x23e   :  { %v441_v57 = vpop.eup %440 }
 0x23f   :  { %v295_v58 = vmul.f32 %v439_v51, %v294_v56  ;;  %v301_v59 = vmul.f32 %v441_v57, %v289_v52  ;;  %vm307_vm4 = vweird.f32 %v441_v57 }
 0x240   :  { %vm308_vm6 = vmor %vm306_vm5, %vm307_vm4 }
 0x241   :  { %v299_v61 = vsel %vm298_vm3, %v439_v51, %v295_v58  ;;  %v302_v62 = vmul.f32 %v441_v57, %v301_v59 }
 0x242   :  { %v310_v63 = vmul.f32 %v299_v61, %v273_v38 }
 0x243   :  { %v303_v1 = vmul.f32 0.5, %v302_v62 }
 0x244   :  { %v316_v2 = vmul.f32 %v436_v60, %v310_v63 }
 0x245   :  { %v304_v3 = vsub.f32 1.5, %v303_v1 }
 0x246   :  { %v322_v4 = vadd.f32 %v437_v0, %v316_v2 }
 0x247   :  { %v305_v5 = vmul.f32 %v441_v57, %v304_v3 }
 0x248   :  { %324 = vst [vmem:[#allocation9] sm:$0xff] %v322_v4 }
 0x249   :  { %v309_v6 = vsel %vm308_vm6, %v441_v57, %v305_v5 }
 0x24a   :  { %v311_v7 = vmul.f32 %v309_v6, %v274_v43 }
 0x24c   :  { %v317_v8 = vmul.f32 %v436_v60, %v311_v7 }
 0x24e   :  { %v323_v9 = vadd.f32 %v437_v0, %v317_v8 }
 0x250   :  { %325 = vst [vmem:[#allocation9 + $0x8] sm:$0xff] %v323_v9 }
 0x251   :  { %338 = dma.vmem_to_hbm [thread:$0]  %s331_s5, 256, %s333_s26, [#allocation5], %s548_s13, %s548_s13, %s549_s14  }
 0x252   :  { %542 = dma.done.wait [#allocation5], 256  }
 0x253   :  { %543 = vsyncadd [#allocation5], 4294967040 }
 0x254   :  { %343 = vsyncpa [#allocation4], 1 }
 0x255   :  { %344 = vsyncpa [#allocation7], 1 }
 0x256   :  { %345 = vsyncpa [#allocation5], 1 }

</bundles_post_ra>
